<compile_context>
chip_gen: v7x
topology: tpu7x:2x2x1
jax: 0.10.0
libtpu: 0.0.40
codegen_flags: <defaults>
</compile_context>

<pallas_src>
import functools
import math

import jax
import jax.numpy as jnp
from jax.experimental import pallas as pl
from jax.experimental.pallas import tpu as pltpu


# ----------------------------------------------------------------------------
# helpers
# ----------------------------------------------------------------------------
_DELTA_CLAMP = math.log(1000.0 / 16.0)   # Detectron2 box-delta scale clamp


def _row_tile(n, cap):
    """Largest 'nice' row tile that exactly divides n (falls back to n itself)."""
    for t in (512, 256, 128, 64, 32, 16, 8):
        if t <= cap and n % t == 0:
            return t
    return n


# ----------------------------------------------------------------------------
# Pallas kernels
# ----------------------------------------------------------------------------
def _preprocess_kernel(img_ref, scale_ref, shift_ref, out_ref):
    """(x - mean) / std computed as x * inv_std + (-mean * inv_std); f32 math, bf16 store."""
    x = img_ref[...]                                  # (1, C, TH, W) f32
    y = x * scale_ref[...] + shift_ref[...]           # scale/shift: (1, C, 1, 1) broadcast
    out_ref[...] = y.astype(out_ref.dtype)


def _conv3x3_s2_kernel(pee_ref, peo_ref, poe_ref, poo_ref, w_ref, b_ref, o_ref,
                       *, th, wout):
    """3x3 / stride-2 / pad-1 conv + bias + ReLU.

    The four spatial-parity planes of the zero-padded input are VMEM resident
    (constant block index), so every tap is a unit-stride shifted read followed by a
    bf16 MXU matmul accumulated in f32 — no im2col ever materializes in HBM."""
    planes = ((pee_ref, peo_ref), (poe_ref, poo_ref))
    r0 = pl.multiple_of(pl.program_id(0) * th, th)
    acc = None
    for di in range(3):
        for dj in range(3):
            p = planes[di % 2][dj % 2]
            slab = p[pl.ds(r0 + di // 2, th), pl.ds(dj // 2, wout), :]   # (th, wout, Cin)
            slab = slab.reshape(th * wout, slab.shape[-1])               # (M, Cin) bf16
            part = jnp.dot(slab, w_ref[di, dj],
                           preferred_element_type=jnp.float32)           # (M, Cout) f32
            acc = part if acc is None else acc + part
    y = jnp.maximum(acc + b_ref[...], 0.0)
    o_ref[...] = y.astype(o_ref.dtype)


def _rpn_fused_kernel(x_ref, wc_ref, bc_ref, wh_ref, bh_ref, o_ref, *, th, wf):
    """Fused RPN head: 3x3 stride-1 conv + ReLU feeding the concatenated
    1x1 objectness + anchor-delta heads.  The conv activation never leaves VMEM."""
    cf = x_ref.shape[-1]
    r0 = pl.multiple_of(pl.program_id(0) * th, th)
    acc = None
    for di in range(3):
        for dj in range(3):
            slab = x_ref[pl.ds(r0 + di, th), pl.ds(dj, wf), :]           # (th, wf, Cf)
            slab = slab.reshape(th * wf, cf)
            part = jnp.dot(slab, wc_ref[di, dj],
                           preferred_element_type=jnp.float32)
            acc = part if acc is None else acc + part
    h = jnp.maximum(acc + bc_ref[...], 0.0)                              # (M, Cf) f32
    out = jnp.dot(h.astype(wh_ref.dtype), wh_ref[...],
                  preferred_element_type=jnp.float32) + bh_ref[...]      # (M, A+4A) f32
    o_ref[...] = out


def _box_head_kernel(x_ref, w1_ref, b1_ref, w2_ref, b2_ref, wh_ref, bh_ref, o_ref):
    """Fully fused ROI box head: fc1+ReLU, fc2+ReLU, [cls_score | bbox_pred]."""
    h1 = jnp.maximum(jnp.dot(x_ref[...], w1_ref[...],
                             preferred_element_type=jnp.float32) + b1_ref[...], 0.0)
    h2 = jnp.maximum(jnp.dot(h1.astype(w2_ref.dtype), w2_ref[...],
                             preferred_element_type=jnp.float32) + b2_ref[...], 0.0)
    o_ref[...] = jnp.dot(h2.astype(wh_ref.dtype), wh_ref[...],
                         preferred_element_type=jnp.float32) + bh_ref[...]


# ----------------------------------------------------------------------------
# Pallas wrappers
# ----------------------------------------------------------------------------
def pallas_preprocess(images_nchw, pixel_mean, pixel_std, out_dtype=jnp.bfloat16):
    """images_nchw: (N, C, H, W) f32 -> normalized (N, C, H, W) bf16."""
    N, C, H, W = images_nchw.shape
    th = _row_tile(H, cap=512)
    scale = (1.0 / pixel_std).reshape(1, C, 1, 1).astype(jnp.float32)
    shift = (-pixel_mean / pixel_std).reshape(1, C, 1, 1).astype(jnp.float32)
    return pl.pallas_call(
        _preprocess_kernel,
        out_shape=jax.ShapeDtypeStruct((N, C, H, W), out_dtype),
        grid_spec=pltpu.PrefetchScalarGridSpec(
            num_scalar_prefetch=0,
            grid=(N, H // th),
            in_specs=[
                pl.BlockSpec((1, C, th, W), lambda n, h: (n, 0, h, 0)),
                pl.BlockSpec((1, C, 1, 1), lambda n, h: (0, 0, 0, 0)),
                pl.BlockSpec((1, C, 1, 1), lambda n, h: (0, 0, 0, 0)),
            ],
            out_specs=pl.BlockSpec((1, C, th, W), lambda n, h: (n, 0, h, 0)),
        ),
        compiler_params=pltpu.CompilerParams(
            dimension_semantics=("parallel", "arbitrary")),
    )(images_nchw.astype(jnp.float32), scale, shift)


def pallas_backbone_conv(x_nchw, w_oihw, b_o, out_dtype=jnp.bfloat16):
    """3x3 / stride-2 / pad-1 conv + ReLU.  x: (1, C, H, W) -> ((H/2)*(W/2), Cout) NHWC-flat."""
    N, C, H, W = x_nchw.shape
    assert N == 1 and H % 2 == 0 and W % 2 == 0
    Cout = w_oihw.shape[0]
    Hout, Wout = H // 2, W // 2

    # Glue layout plumbing (bytes ~= one input copy, NOT a 9x im2col):
    # zero-pad the already-normalized image, go NHWC, split spatial parities.
    xp = jnp.transpose(jnp.pad(x_nchw[0], ((0, 0), (1, 1), (1, 1))), (1, 2, 0))
    pee = xp[0::2, 0::2, :]
    peo = xp[0::2, 1::2, :]
    poe = xp[1::2, 0::2, :]
    poo = xp[1::2, 1::2, :]                                        # each (Hout+1, Wout+1, C)

    w = jnp.transpose(w_oihw, (2, 3, 1, 0)).astype(jnp.bfloat16)   # (3, 3, Cin, Cout)
    b = b_o.reshape(1, Cout).astype(jnp.float32)

    th = _row_tile(Hout, cap=128)
    plane_spec = pl.BlockSpec(pee.shape, lambda i: (0, 0, 0))
    kernel = functools.partial(_conv3x3_s2_kernel, th=th, wout=Wout)
    out = pl.pallas_call(
        kernel,
        out_shape=jax.ShapeDtypeStruct((Hout * Wout, Cout), out_dtype),
        grid_spec=pltpu.PrefetchScalarGridSpec(
            num_scalar_prefetch=0,
            grid=(Hout // th,),
            in_specs=[plane_spec, plane_spec, plane_spec, plane_spec,
                      pl.BlockSpec((3, 3, C, Cout), lambda i: (0, 0, 0, 0)),
                      pl.BlockSpec((1, Cout), lambda i: (0, 0))],
            out_specs=pl.BlockSpec((th * Wout, Cout), lambda i: (i, 0)),
        ),
        compiler_params=pltpu.CompilerParams(dimension_semantics=("arbitrary",)),
    )(pee, peo, poe, poo, w, b)
    return out, Hout, Wout


def pallas_rpn_fused(feat_hwc, wc_oihw, bc, w_obj, b_obj, w_delta, b_delta):
    """Fused RPN: 3x3 conv + ReLU + concatenated 1x1 objectness/delta heads.
    feat_hwc: (Hf, Wf, Cf) bf16 -> (Hf*Wf, A + 4A) f32."""
    Hf, Wf, Cf = feat_hwc.shape
    Cmid = wc_oihw.shape[0]
    featp = jnp.pad(feat_hwc, ((1, 1), (1, 1), (0, 0)))             # (Hf+2, Wf+2, Cf)
    wc = jnp.transpose(wc_oihw, (2, 3, 1, 0)).astype(jnp.bfloat16)  # (3, 3, Cf, Cmid)
    bc_ = bc.reshape(1, Cmid).astype(jnp.float32)
    wh = jnp.concatenate([w_obj, w_delta], axis=1).astype(jnp.bfloat16)      # (Cmid, A+4A)
    bh = jnp.concatenate([b_obj, b_delta], axis=0).reshape(1, -1).astype(jnp.float32)
    nh = wh.shape[1]

    th = _row_tile(Hf, cap=64)
    kernel = functools.partial(_rpn_fused_kernel, th=th, wf=Wf)
    return pl.pallas_call(
        kernel,
        out_shape=jax.ShapeDtypeStruct((Hf * Wf, nh), jnp.float32),
        grid_spec=pltpu.PrefetchScalarGridSpec(
            num_scalar_prefetch=0,
            grid=(Hf // th,),
            in_specs=[
                pl.BlockSpec(featp.shape, lambda i: (0, 0, 0)),
                pl.BlockSpec((3, 3, Cf, Cmid), lambda i: (0, 0, 0, 0)),
                pl.BlockSpec((1, Cmid), lambda i: (0, 0)),
                pl.BlockSpec((Cmid, nh), lambda i: (0, 0)),
                pl.BlockSpec((1, nh), lambda i: (0, 0)),
            ],
            out_specs=pl.BlockSpec((th * Wf, nh), lambda i: (i, 0)),
        ),
        compiler_params=pltpu.CompilerParams(dimension_semantics=("arbitrary",)),
    )(featp, wc, bc_, wh, bh)


def pallas_box_head(roi_feats, w1, b1, w2, b2, w_cls, b_cls, w_box, b_box):
    """One-launch ROI box head.  roi_feats: (K, Cf) -> (K, num_classes+1+4) f32."""
    K = roi_feats.shape[0]
    wh = jnp.concatenate([w_cls, w_box], axis=1).astype(jnp.bfloat16)
    bh = jnp.concatenate([b_cls, b_box], axis=0).reshape(1, -1).astype(jnp.float32)
    return pl.pallas_call(
        _box_head_kernel,
        out_shape=jax.ShapeDtypeStruct((K, wh.shape[1]), jnp.float32),
    )(roi_feats.astype(jnp.bfloat16),
      w1.astype(jnp.bfloat16), b1.reshape(1, -1).astype(jnp.float32),
      w2.astype(jnp.bfloat16), b2.reshape(1, -1).astype(jnp.float32),
      wh, bh)


# ----------------------------------------------------------------------------
# JAX glue (anchors / box math)
# ----------------------------------------------------------------------------
def make_anchors(hf, wf, stride, sizes):
    ys = (jnp.arange(hf, dtype=jnp.float32) + 0.5) * stride
    xs = (jnp.arange(wf, dtype=jnp.float32) + 0.5) * stride
    cy, cx = jnp.meshgrid(ys, xs, indexing="ij")
    centers = jnp.stack([cx.ravel(), cy.ravel()], -1)      # (HW, 2) in (x, y)
    anchors = []
    for s in sizes:
        half = s / 2.0
        anchors.append(jnp.concatenate([centers - half, centers + half], -1))
    return jnp.stack(anchors, axis=1).reshape(-1, 4)       # (HW*A, 4)


def decode_boxes(anchors, deltas):
    wa = anchors[:, 2] - anchors[:, 0]
    ha = anchors[:, 3] - anchors[:, 1]
    cxa = anchors[:, 0] + 0.5 * wa
    cya = anchors[:, 1] + 0.5 * ha
    dx, dy, dw, dh = deltas[:, 0], deltas[:, 1], deltas[:, 2], deltas[:, 3]
    cx = cxa + dx * wa
    cy = cya + dy * ha
    w = wa * jnp.exp(jnp.minimum(dw, _DELTA_CLAMP))
    h = ha * jnp.exp(jnp.minimum(dh, _DELTA_CLAMP))
    return jnp.stack([cx - 0.5 * w, cy - 0.5 * h, cx + 0.5 * w, cy + 0.5 * h], -1)


# ----------------------------------------------------------------------------
# TemporalRCNN (Pallas) — inference forward
# ----------------------------------------------------------------------------
class TemporalRCNNPallas:
    def __init__(self, key,
                 in_channels=3, feat_channels=32, fc_dim=64,
                 num_anchors=3, num_classes=1, topk_proposals=16,
                 backbone_stride=2):
        self.C = in_channels
        self.Cf = feat_channels
        self.fc_dim = fc_dim
        self.A = num_anchors
        self.num_classes = num_classes
        self.topk = topk_proposals
        self.stride = backbone_stride
        self.anchor_sizes = [8.0, 16.0, 32.0]

        # Detectron2-style pixel statistics (registered buffers in the original module).
        self.pixel_mean = jnp.array([103.53, 116.28, 123.675], dtype=jnp.float32)
        self.pixel_std = jnp.array([57.375, 57.12, 58.395], dtype=jnp.float32)

        self.organ_loss_factor = {"thyroid": 1.0, "breast": 1.0}
        self.organ_specific = ()          # cls / rpn_cls switching disabled
        self.rpn_only_test = False
        self.use_flow_context = False
        self.use_deform_context = False

        # Deterministic parameter init.
        ks = jax.random.split(key, 8)
        s = 0.05
        self.backbone_w = jax.random.normal(ks[0], (self.Cf, self.C, 3, 3), jnp.float32) * s
        self.backbone_b = jnp.zeros((self.Cf,), jnp.float32)
        self.rpn_conv_w = jax.random.normal(ks[1], (self.Cf, self.Cf, 3, 3), jnp.float32) * s
        self.rpn_conv_b = jnp.zeros((self.Cf,), jnp.float32)
        self.rpn_obj_w = jax.random.normal(ks[2], (self.Cf, self.A), jnp.float32) * s
        self.rpn_obj_b = jnp.zeros((self.A,), jnp.float32)
        self.rpn_delta_w = jax.random.normal(ks[3], (self.Cf, 4 * self.A), jnp.float32) * s
        self.rpn_delta_b = jnp.zeros((4 * self.A,), jnp.float32)
        self.fc1_w = jax.random.normal(ks[4], (self.Cf, fc_dim), jnp.float32) * s
        self.fc1_b = jnp.zeros((fc_dim,), jnp.float32)
        self.fc2_w = jax.random.normal(ks[5], (fc_dim, fc_dim), jnp.float32) * s
        self.fc2_b = jnp.zeros((fc_dim,), jnp.float32)
        self.cls_w = jax.random.normal(ks[6], (fc_dim, num_classes + 1), jnp.float32) * s
        self.cls_b = jnp.zeros((num_classes + 1,), jnp.float32)
        self.bbox_w = jax.random.normal(ks[7], (fc_dim, 4), jnp.float32) * s
        self.bbox_b = jnp.zeros((4,), jnp.float32)

    # ---- preprocess_image -------------------------------------------------
    def preprocess_image(self, batched_inputs):
        imgs = jnp.stack([x["image"] for x in batched_inputs], 0).astype(jnp.float32)
        images = pallas_preprocess(imgs, self.pixel_mean, self.pixel_std)
        # images_flow (= normalized image / 255 in the reference code) is only consumed by
        # flow-context ROI heads; use_flow_context == False, so it is not computed here.
        images_flow = None
        N, C, H, W = images.shape
        # TODO(synk): imagelist_from_tensors variable-size padding to size_divisibility
        # is omitted (single fixed-size frame here), so valid_ratios == 1.
        image_sizes = jnp.array([[H, W]] * N, jnp.float32)
        valid_ratios = image_sizes / jnp.array([[H, W]], jnp.float32)
        return images, images_flow, valid_ratios, image_sizes

    # ---- forward (inference path of TemporalRCNN.forward) ------------------
    def forward_infer(self, frame_input):
        organ = frame_input["dataset"].split("@")[0].split("_")[0]
        assert organ in ("breast", "thyroid")
        # organ-specific cls / rpn_cls head switching disabled (organ_specific == ()).

        images, _images_flow, valid_ratios, _image_sizes = self.preprocess_image([frame_input])
        N, C, H, W = images.shape
        assert N == 1

        # Backbone: fused 3x3 stride-2 conv + ReLU (taps accumulated in-kernel, no im2col).
        feat2d, Hf, Wf = pallas_backbone_conv(images, self.backbone_w, self.backbone_b)
        feat_hwc = feat2d.reshape(Hf, Wf, self.Cf)        # free reshape (row-major compatible)

        # RPN: 3x3 conv + ReLU + objectness / anchor-delta heads, all in one kernel.
        rpn_out = pallas_rpn_fused(feat_hwc, self.rpn_conv_w, self.rpn_conv_b,
                                   self.rpn_obj_w, self.rpn_obj_b,
                                   self.rpn_delta_w, self.rpn_delta_b)    # (Hf*Wf, A+4A)
        obj_logits = rpn_out[:, :self.A]                                  # (HW, A)
        anchor_deltas = rpn_out[:, self.A:]                               # (HW, 4A)

        anchors = make_anchors(Hf, Wf, self.stride, self.anchor_sizes)    # (HW*A, 4)
        scores = obj_logits.reshape(-1)                                   # (HW*A,)
        deltas = anchor_deltas.reshape(-1, 4)                             # (HW*A, 4)
        prop_boxes = decode_boxes(anchors, deltas)
        prop_boxes = jnp.clip(prop_boxes,
                              jnp.array([0.0, 0.0, 0.0, 0.0], jnp.float32),
                              jnp.array([W - 1.0, H - 1.0, W - 1.0, H - 1.0], jnp.float32))
        # TODO(synk): RPN NMS has no clean Pallas/TPU equivalent; top-k selection only.
        top_scores, top_idx = jax.lax.top_k(scores, self.topk)
        proposals = prop_boxes[top_idx]                                   # (K, 4)

        if self.rpn_only_test:
            return {"proposal_boxes": proposals, "objectness_logits": top_scores}

        # ROI heads (box head).
        # TODO(synk): ROIAlign bilinear pooling replaced by center-point feature gather.
        cx = (proposals[:, 0] + proposals[:, 2]) * 0.5
        cy = (proposals[:, 1] + proposals[:, 3]) * 0.5
        fx = jnp.clip((cx / self.stride).astype(jnp.int32), 0, Wf - 1)
        fy = jnp.clip((cy / self.stride).astype(jnp.int32), 0, Hf - 1)
        roi_feats = feat2d[fy * Wf + fx]                                  # (K, Cf) bf16

        head_out = pallas_box_head(roi_feats, self.fc1_w, self.fc1_b,
                                   self.fc2_w, self.fc2_b,
                                   self.cls_w, self.cls_b,
                                   self.bbox_w, self.bbox_b)              # (K, nc+1+4)
        nc1 = self.num_classes + 1
        cls_logits = head_out[:, :nc1]
        box_deltas = head_out[:, nc1:nc1 + 4]

        probs = jax.nn.softmax(cls_logits, axis=-1)[:, :-1]               # drop background
        det_scores = probs.max(-1)
        pred_classes = probs.argmax(-1)
        det_boxes = decode_boxes(proposals, box_deltas)

        # postprocess: rescale to requested output size (detector_postprocess).
        out_h = float(frame_input.get("height", H))
        out_w = float(frame_input.get("width", W))
        scale = jnp.array([out_w / W, out_h / H, out_w / W, out_h / H], jnp.float32)
        det_boxes = det_boxes * scale[None, :]
        det_boxes = jnp.clip(det_boxes,
                             jnp.array([0.0, 0.0, 0.0, 0.0], jnp.float32),
                             jnp.array([out_w, out_h, out_w, out_h], jnp.float32))

        return {"pred_boxes": det_boxes, "scores": det_scores,
                "pred_classes": pred_classes, "valid_ratios": valid_ratios}

    # TODO(synk): forward_train (RPN / Fast-RCNN losses with GT matching, sampling, NMS)
    # has no clean Pallas equivalent and is not implemented; only the organ loss scaling
    # and the shared feature/proposal compute above are reproduced.


if __name__ == "__main__":
    key = jax.random.PRNGKey(0)
    k_img, k_param = jax.random.split(key)
    # Small shapes: single frame, 3x32x32 image (PyTorch CHW layout).
    img = jax.random.uniform(k_img, (3, 32, 32), jnp.float32, minval=0.0, maxval=255.0)
    frame_input = {"image": img, "dataset": "breast_us@hospitalA", "height": 32, "width": 32}

    model = TemporalRCNNPallas(k_param)
    out = model.forward_infer(frame_input)
    out = jax.block_until_ready(out)

    assert out["pred_boxes"].shape == (model.topk, 4)
    assert out["scores"].shape == (model.topk,)
    assert bool(jnp.all(jnp.isfinite(out["pred_boxes"])))
    print("KERNEL_OK")
</pallas_src>

<mosaic_0001>
module attributes {stable_mosaic.version = 11 : i64} {
  func.func @_preprocess_kernel(%arg0: i32, %arg1: i32, %arg2: memref<1x3x32x32xf32, #tpu.memory_space<vmem>>, %arg3: memref<1x3x1x1xf32, #tpu.memory_space<vmem>>, %arg4: memref<1x3x1x1xf32, #tpu.memory_space<vmem>>, %arg5: memref<1x3x32x32xbf16, #tpu.memory_space<vmem>>) attributes {dimension_semantics = [#tpu.dimension_semantics<parallel>, #tpu.dimension_semantics<arbitrary>], iteration_bounds = array<i64: 1, 1>, scalar_prefetch = 0 : i64, scratch_operands = 0 : i64, tpu.core_type = #tpu.core_type<tc>, window_params = [{transform_indices = @transform_0, window_bounds = array<i64: 1, 3, 32, 32>}, {pipeline_mode = #tpu.pipeline_mode<synchronous>, transform_indices = @transform_1, window_bounds = array<i64: 1, 3, 1, 1>}, {pipeline_mode = #tpu.pipeline_mode<synchronous>, transform_indices = @transform_2, window_bounds = array<i64: 1, 3, 1, 1>}, {transform_indices = @transform_3, window_bounds = array<i64: 1, 3, 32, 32>}]} {
    %c0 = arith.constant 0 : index
    %c0_0 = arith.constant 0 : index
    %c0_1 = arith.constant 0 : index
    %c0_2 = arith.constant 0 : index
    %0 = vector.load %arg2[%c0, %c0_0, %c0_1, %c0_2] : memref<1x3x32x32xf32, #tpu.memory_space<vmem>>, vector<1x3x32x32xf32>
    %c0_3 = arith.constant 0 : index
    %c0_4 = arith.constant 0 : index
    %c0_5 = arith.constant 0 : index
    %c0_6 = arith.constant 0 : index
    %1 = vector.load %arg3[%c0_3, %c0_4, %c0_5, %c0_6] : memref<1x3x1x1xf32, #tpu.memory_space<vmem>>, vector<1x3x1x1xf32>
    %2 = vector.broadcast %1 : vector<1x3x1x1xf32> to vector<1x3x32x32xf32>
    %3 = arith.mulf %0, %2 : vector<1x3x32x32xf32>
    %c0_7 = arith.constant 0 : index
    %c0_8 = arith.constant 0 : index
    %c0_9 = arith.constant 0 : index
    %c0_10 = arith.constant 0 : index
    %4 = vector.load %arg4[%c0_7, %c0_8, %c0_9, %c0_10] : memref<1x3x1x1xf32, #tpu.memory_space<vmem>>, vector<1x3x1x1xf32>
    %5 = vector.broadcast %4 : vector<1x3x1x1xf32> to vector<1x3x32x32xf32>
    %6 = arith.addf %3, %5 : vector<1x3x32x32xf32>
    %7 = arith.truncf %6 : vector<1x3x32x32xf32> to vector<1x3x32x32xbf16>
    %c0_11 = arith.constant 0 : index
    %c0_12 = arith.constant 0 : index
    %c0_13 = arith.constant 0 : index
    %c0_14 = arith.constant 0 : index
    %8 = vector.load %arg5[%c0_11, %c0_12, %c0_13, %c0_14] : memref<1x3x32x32xbf16, #tpu.memory_space<vmem>>, vector<1x3x32x32xbf16>
    tpu.vector_store %arg5[%c0_11, %c0_12, %c0_13, %c0_14], %7 {strides = array<i32>} : memref<1x3x32x32xbf16, #tpu.memory_space<vmem>>, vector<1x3x32x32xbf16>,
    return
  }
  func.func @transform_0(%arg0: i32, %arg1: i32) -> (i32, i32, i32, i32) {
    %c0_i32 = arith.constant 0 : i32
    %c0_i32_0 = arith.constant 0 : i32
    %c0_i32_1 = arith.constant 0 : i32
    return %arg0, %c0_i32, %arg1, %c0_i32_0 : i32, i32, i32, i32
  }
  func.func @transform_1(%arg0: i32, %arg1: i32) -> (i32, i32, i32, i32) {
    %c0_i32 = arith.constant 0 : i32
    %c0_i32_0 = arith.constant 0 : i32
    %c0_i32_1 = arith.constant 0 : i32
    %c0_i32_2 = arith.constant 0 : i32
    %c0_i32_3 = arith.constant 0 : i32
    return %c0_i32, %c0_i32_0, %c0_i32_1, %c0_i32_2 : i32, i32, i32, i32
  }
  func.func @transform_2(%arg0: i32, %arg1: i32) -> (i32, i32, i32, i32) {
    %c0_i32 = arith.constant 0 : i32
    %c0_i32_0 = arith.constant 0 : i32
    %c0_i32_1 = arith.constant 0 : i32
    %c0_i32_2 = arith.constant 0 : i32
    %c0_i32_3 = arith.constant 0 : i32
    return %c0_i32, %c0_i32_0, %c0_i32_1, %c0_i32_2 : i32, i32, i32, i32
  }
  func.func @transform_3(%arg0: i32, %arg1: i32) -> (i32, i32, i32, i32) {
    %c0_i32 = arith.constant 0 : i32
    %c0_i32_0 = arith.constant 0 : i32
    %c0_i32_1 = arith.constant 0 : i32
    return %arg0, %c0_i32, %arg1, %c0_i32_0 : i32, i32, i32, i32
  }
}

</mosaic_0001>

<bundles_post_ra>
// kernel: tpu_custom_call.1
= control target key start
LH: loop header
LB: loop body
LE: loop exit
PB: predicated region body
PF: predicated region fallthrough
CT: control target
= control target key end

     0   :  { %8 = vsyncpa [#allocation3], 0  ;;  %s378_s0 = inlined_call_operand.hbm [shape: f32[1,3,32,32], index: 0, kind: input, shape index: {}]   ;;  %s379_s1 = inlined_call_operand.vmem [shape: f32[1,3,1,1], index: 1, kind: input, shape index: {}]   ;;  %s380_s2 = inlined_call_operand.vmem [shape: f32[1,3,1,1], index: 2, kind: input, shape index: {}]   ;;  %s381_s3 = inlined_call_operand.hbm [shape: bf16[1,3,32,32], index: 3, kind: output, shape index: {}]  }
   0x1   :  { %9 = vsyncpa [#allocation4], 0  ;;  %s290_s12 = smov [#allocation2]   ;;  %s242_s16 = scalar_lea.hbm %s378_s0, 1536 }
   0x2   :  { %s15_s13 = sshll.u32 %s290_s12, 4  ;;  %p243_p0 = scmp.ne.s32.totalorder %s378_s0, %s242_s16  ;;  %s16_s13 = int_to_ptr.vmem [resolvable:$true] %s15_s13 }
   0x3   :  { %p246_p1 = scmp.lt.u32.totalorder %s242_s16, %s378_s0 }
   0x5   :  { %p248_p2 = pnand %p246_p1, %p243_p0 }
   0x7   :  { %251 = shalt.err (!%p248_p2)
}
   0x8   :  { %s252_s21 = scalar_lea.vmem %s16_s13, 1536  ;;  %p257_p4 = scmp.lt.s32.totalorder %s16_s13, %s16_s13 }
   0x9   :  { %p253_p3 = scmp.ne.s32.totalorder %s16_s13, %s252_s21  ;;  %p258_p5 = scmp.lt.s32.totalorder %s252_s21, %s252_s21 }
   0xb   :  { %p259_p6 = por %p258_p5, %p257_p4 }
   0xd   :  { %p260_p7 = pnand %p259_p6, %p253_p3 }
   0xf   :  { %263 = shalt.err (!%p260_p7)
}
  0x10   :  { %s291_s22 = smov 128   ;;  %s292_s23 = smov 8  }
  0x11   :  { %21 = dma.hbm_to_vmem [thread:$0]  %s378_s0, 1536, %s16_s13, [#allocation3], %s291_s22, %s291_s22, %s292_s23  }
  0x12   :  { %286 = dma.done.wait [#allocation3], 1536  }
  0x13   :  { %287 = vsyncadd [#allocation3], 4294965760  ;;  %v293_v0 = vmov 0   ;;  %v205_v1 = vld [vmem:[%s379_s1 + $0x2] ss:$0 sm:$0xff]  ;;  %v30_v10 = vld [vmem:[#allocation2 + $0x8] sm:$0xff] }
  0x14   :  { %241 = vset.pattern.permute.xlu1 %v293_v0  ;;  %240 = vset.pattern.permute.xlu0 %v293_v0  ;;  %v203_v2 = vld [vmem:[%s379_s1] ss:$0 sm:$0xff]  ;;  %v204_v4 = vld [vmem:[%s379_s1 + $0x1] ss:$0 sm:$0xff]  ;;  %v208_v5 = vld [vmem:[%s380_s2 + $0x2] ss:$0 sm:$0xff] }
  0x15   :  { %68 = vperm.xlu1 %241, %v205_v1   ;;  %60 = vperm.xlu0 %240, %v203_v2   ;;  %v206_v3 = vld [vmem:[%s380_s2] ss:$0 sm:$0xff]  ;;  %v207_v6 = vld [vmem:[%s380_s2 + $0x1] ss:$0 sm:$0xff]  ;;  %v31_v11 = vld [vmem:[#allocation2 + $0x10] sm:$0xff]  ;;  %vm173_vm0 = vcmask 257024  }
  0x16   :  { %v29_v7 = vld [vmem:[#allocation2] sm:$0xff]  ;;  %v32_v12 = vld [vmem:[#allocation2 + $0x18] sm:$0xff]  ;;  %v38_v18 = vld [vmem:[#allocation2 + $0x48] sm:$0xff]  ;;  %s294_s1 = smov [#allocation5]  }
  0x17   :  { %v37_v13 = vld [vmem:[#allocation2 + $0x40] sm:$0xff]  ;;  %v39_v19 = vld [vmem:[#allocation2 + $0x50] sm:$0xff]  ;;  %v40_v20 = vld [vmem:[#allocation2 + $0x58] sm:$0xff]  ;;  %s191_s2 = sshll.u32 %s294_s1, 4  ;;  %s351_s2 = int_to_ptr.vmem [resolvable:$true] %s191_s2 }
  0x18   :  { %v33_v23 = vld [vmem:[#allocation2 + $0x20] sm:$0xff]  ;;  %v34_v28 = vld [vmem:[#allocation2 + $0x28] sm:$0xff]  ;;  %v35_v29 = vld [vmem:[#allocation2 + $0x30] sm:$0xff]  ;;  %s264_s10 = scalar_lea.vmem %s351_s2, 768  ;;  %p269_p9 = scmp.lt.s32.totalorder %s351_s2, %s351_s2 }
  0x19   :  { %102 = vperm.xlu1 %241, %v206_v3   ;;  %64 = vperm.xlu0 %240, %v204_v4   ;;  %v36_v30 = vld [vmem:[#allocation2 + $0x38] sm:$0xff]  ;;  %p265_p8 = scmp.ne.s32.totalorder %s351_s2, %s264_s10  ;;  %p270_p10 = scmp.lt.s32.totalorder %s264_s10, %s264_s10 }
  0x1b   :  { %p271_p11 = por %p270_p10, %p269_p9 }
  0x1d   :  { %110 = vperm.xlu1 %241, %v208_v5   ;;  %106 = vperm.xlu0 %240, %v207_v6   ;;  %p272_p12 = pnand %p271_p11, %p265_p8 }
  0x94   :  { %v69_v8 = vpop.permute.xlu1 %68  ;;  %v61_v9 = vpop.permute.xlu0 %60 }
  0x95   :  { %v71_v14 = vmul.f32 %v61_v9, %v29_v7  ;;  %v72_v15 = vmul.f32 %v61_v9, %v30_v10  ;;  %v73_v16 = vmul.f32 %v61_v9, %v31_v11  ;;  %v74_v17 = vmul.f32 %v61_v9, %v32_v12 }
  0x96   :  { %v79_v31 = vmul.f32 %v69_v8, %v37_v13  ;;  %v80_v32 = vmul.f32 %v69_v8, %v38_v18  ;;  %v81_v33 = vmul.f32 %v69_v8, %v39_v19  ;;  %v82_v34 = vmul.f32 %v69_v8, %v40_v20 }
  0x98   :  { %v103_v21 = vpop.permute.xlu1 %102  ;;  %v65_v22 = vpop.permute.xlu0 %64 }
  0x99   :  { %v113_v24 = vadd.f32 %v103_v21, %v71_v14  ;;  %v114_v25 = vadd.f32 %v103_v21, %v72_v15  ;;  %v115_v26 = vadd.f32 %v103_v21, %v73_v16  ;;  %v116_v27 = vadd.f32 %v103_v21, %v74_v17 }
  0x9a   :  { %v75_v41 = vmul.f32 %v65_v22, %v33_v23  ;;  %v76_v42 = vmul.f32 %v65_v22, %v34_v28  ;;  %v77_v43 = vmul.f32 %v65_v22, %v35_v29  ;;  %v78_v44 = vmul.f32 %v65_v22, %v36_v30 }
  0x9b   :  { %v221_v35 = vpack.c.bf16 %v113_v24, %v113_v24  ;;  %v222_v36 = vpack.c.bf16 %v114_v25, %v114_v25  ;;  %v223_v37 = vpack.c.bf16 %v115_v26, %v115_v26  ;;  %v224_v38 = vpack.c.bf16 %v116_v27, %v116_v27 }
  0x9c   :  { %v111_v39 = vpop.permute.xlu1 %110  ;;  %v107_v40 = vpop.permute.xlu0 %106 }
  0x9d   :  { %174 = vst.msk [vmem:[#allocation5] sm:$0xf] %vm173_vm0, %v221_v35  ;;  %175 = vst.msk [vmem:[#allocation5 + $0x4] sm:$0xf] %vm173_vm0, %v222_v36  ;;  %v121_v45 = vadd.f32 %v111_v39, %v79_v31  ;;  %v122_v46 = vadd.f32 %v111_v39, %v80_v32  ;;  %v123_v47 = vadd.f32 %v111_v39, %v81_v33 }
  0x9e   :  { %176 = vst.msk [vmem:[#allocation5 + $0x8] sm:$0xf] %vm173_vm0, %v223_v37  ;;  %177 = vst.msk [vmem:[#allocation5 + $0xc] sm:$0xf] %vm173_vm0, %v224_v38  ;;  %v124_v48 = vadd.f32 %v111_v39, %v82_v34  ;;  %v117_v49 = vadd.f32 %v107_v40, %v75_v41  ;;  %v118_v50 = vadd.f32 %v107_v40, %v76_v42 }
  0x9f   :  { %v119_v51 = vadd.f32 %v107_v40, %v77_v43  ;;  %v120_v52 = vadd.f32 %v107_v40, %v78_v44  ;;  %v229_v53 = vpack.c.bf16 %v121_v45, %v121_v45  ;;  %v230_v54 = vpack.c.bf16 %v122_v46, %v122_v46 }
  0xa0   :  { %v231_v55 = vpack.c.bf16 %v123_v47, %v123_v47  ;;  %v232_v56 = vpack.c.bf16 %v124_v48, %v124_v48  ;;  %v225_v57 = vpack.c.bf16 %v117_v49, %v117_v49  ;;  %v226_v58 = vpack.c.bf16 %v118_v50, %v118_v50 }
  0xa1   :  { %v227_v59 = vpack.c.bf16 %v119_v51, %v119_v51  ;;  %v228_v60 = vpack.c.bf16 %v120_v52, %v120_v52  ;;  %182 = vst.msk [vmem:[#allocation5 + $0x20] sm:$0xf] %vm173_vm0, %v229_v53  ;;  %183 = vst.msk [vmem:[#allocation5 + $0x24] sm:$0xf] %vm173_vm0, %v230_v54 }
  0xa2   :  { %184 = vst.msk [vmem:[#allocation5 + $0x28] sm:$0xf] %vm173_vm0, %v231_v55  ;;  %185 = vst.msk [vmem:[#allocation5 + $0x2c] sm:$0xf] %vm173_vm0, %v232_v56 }
  0xa3   :  { %178 = vst.msk [vmem:[#allocation5 + $0x10] sm:$0xf] %vm173_vm0, %v225_v57  ;;  %179 = vst.msk [vmem:[#allocation5 + $0x14] sm:$0xf] %vm173_vm0, %v226_v58 }
  0xa4   :  { %180 = vst.msk [vmem:[#allocation5 + $0x18] sm:$0xf] %vm173_vm0, %v227_v59  ;;  %181 = vst.msk [vmem:[#allocation5 + $0x1c] sm:$0xf] %vm173_vm0, %v228_v60 }
  0xa5   :  { %275 = shalt.err (!%p272_p12)
}
  0xa6   :  { %s276_s13 = scalar_lea.hbm %s381_s3, 768 }
  0xa7   :  { %p277_p13 = scmp.ne.s32.totalorder %s381_s3, %s276_s13  ;;  %p280_p0 = scmp.lt.u32.totalorder %s276_s13, %s381_s3 }
  0xa9   :  { %p282_p1 = pnand %p280_p0, %p277_p13 }
  0xab   :  { %285 = shalt.err (!%p282_p1)
}
  0xac   :  { %s295_s18 = smov 64   ;;  %s296_s19 = smov 4  }
  0xad   :  { %197 = dma.vmem_to_hbm [thread:$0]  %s351_s2, 768, %s381_s3, [#allocation4], %s295_s18, %s295_s18, %s296_s19  }
  0xae   :  { %288 = dma.done.wait [#allocation4], 768  }
  0xaf   :  { %289 = vsyncadd [#allocation4], 4294966528 }
  0xb0   :  { %201 = vsyncpa [#allocation3], 1 }
  0xb1   :  { %202 = vsyncpa [#allocation4], 1 }

</bundles_post_ra>
